<compile_context>
chip_gen: v6e
topology: v6e:2x2x1
jax: 0.10.0
libtpu: 0.0.40
codegen_flags: <defaults>
</compile_context>

<pallas_src>
import functools

import jax
import jax.numpy as jnp
from jax import lax
from jax.experimental import pallas as pl
from jax.experimental.pallas import tpu as pltpu

block_size = 8   # max sequence length (causal mask size)
head_size = 16
n_embd = 32
num_heads = 2


def _mha_fused_kernel(x_ref, w_ref, b_ref, o_ref, *, B, T, C, H, hs):
    """Single invocation: fused (lane-dense) QKV projection + causal attention, all heads."""
    x = x_ref[...]                      # (B, T, C)
    w = w_ref[...]                      # (C, 128): [q heads | k heads | v heads | zero pad]
    bias = b_ref[...]                   # (1, 128)

    # One MXU push covers every projection of every head for every batch row.
    # Result is a full 128-lane slab thanks to the zero-padded packed weight.
    x2d = x.reshape(B * T, C)
    qkv = jnp.dot(x2d, w, preferred_element_type=jnp.float32) + bias   # (B*T, 128)

    # Split the Q / K / V thirds ONCE (hoisted out of the head loop).
    q_all = qkv[:, 0 * H * hs:1 * H * hs]    # (B*T, H*hs)
    k_all = qkv[:, 1 * H * hs:2 * H * hs]    # (B*T, H*hs)
    v_all = qkv[:, 2 * H * hs:3 * H * hs]    # (B*T, H*hs)

    # Additive causal mask, built once: 0 where attended, -inf where masked.
    # Diagonal is always unmasked -> every row max is finite, no NaN risk.
    row_ids = lax.broadcasted_iota(jnp.int32, (T, T), 0)
    col_ids = lax.broadcasted_iota(jnp.int32, (T, T), 1)
    mask_bias = jnp.where(col_ids <= row_ids, 0.0, -jnp.inf).astype(jnp.float32)
    mask_bias = mask_bias[None, :, :]   # (1, T, T), broadcasts over batch

    scale = hs ** (-0.5)

    head_outs = []
    for h in range(H):                  # static unroll (H = 2)
        q = q_all[:, h * hs:(h + 1) * hs].reshape(B, T, hs)
        k = k_all[:, h * hs:(h + 1) * hs].reshape(B, T, hs)
        v = v_all[:, h * hs:(h + 1) * hs].reshape(B, T, hs)

        # Batched over B on the MXU; additive mask replaces the per-head select.
        s = jnp.einsum('btd,bsd->bts', q, k,
                       preferred_element_type=jnp.float32) * scale + mask_bias

        m = jnp.max(s, axis=-1, keepdims=True)
        p = jnp.exp(s - m)
        denom = jnp.sum(p, axis=-1, keepdims=True)
        wei = p * pl.reciprocal(denom, approx=True)          # EUP reciprocal

        head_outs.append(jnp.einsum('bts,bsd->btd', wei, v,
                                    preferred_element_type=jnp.float32))

    # torch.cat(dim=-1): one lane concat across heads, ONE dense store of the result.
    o_ref[...] = jnp.concatenate(head_outs, axis=-1)          # (B, T, H*hs)


@jax.jit
def multi_head_attention(x, w_fused, b_fused):
    """x: (B, T, C); w_fused: (C, 128); b_fused: (1, 128). Returns (B, T, H*hs)."""
    B, T, C = x.shape
    H = num_heads
    hs = head_size
    kernel = functools.partial(_mha_fused_kernel, B=B, T=T, C=C, H=H, hs=hs)
    return pl.pallas_call(
        kernel,
        out_shape=jax.ShapeDtypeStruct((B, T, H * hs), jnp.float32),
        in_specs=[
            pl.BlockSpec(memory_space=pltpu.MemorySpace.VMEM),   # x
            pl.BlockSpec(memory_space=pltpu.MemorySpace.VMEM),   # fused padded weight
            pl.BlockSpec(memory_space=pltpu.MemorySpace.VMEM),   # fused padded bias
        ],
        out_specs=pl.BlockSpec(memory_space=pltpu.MemorySpace.VMEM),
    )(x, w_fused, b_fused)


def pack_qkv_params(wq, wk, wv, bq, bk, bv):
    """Per-head params (H, C, hs)/(H, hs) -> packed, lane-padded (C, 128) weight + (1, 128) bias.

    Column layout: [q_head0 | q_head1 | ... | k_heads... | v_heads... | zero pad to 128],
    so the kernel's per-head column slices line up with torch.cat([head outs], dim=-1).
    Zero padding keeps the projection output a full 128-lane slab; the padded columns are
    never read by the kernel. One-time prep; not on the per-call hot path.
    """
    C = wq.shape[1]

    def heads_to_cols(w):     # (H, C, hs) -> (C, H*hs), head-major columns
        return jnp.transpose(w, (1, 0, 2)).reshape(C, -1)

    w_fused = jnp.concatenate(
        [heads_to_cols(wq), heads_to_cols(wk), heads_to_cols(wv)], axis=1)
    b_fused = jnp.concatenate(
        [bq.reshape(-1), bk.reshape(-1), bv.reshape(-1)])[None, :]

    ncols = w_fused.shape[1]
    padded = max(128, ((ncols + 127) // 128) * 128)
    if ncols < padded:
        w_fused = jnp.pad(w_fused, ((0, 0), (0, padded - ncols)))
        b_fused = jnp.pad(b_fused, ((0, 0), (0, padded - ncols)))
    return w_fused, b_fused


def _reference(x, wq, wk, wv, bq, bk, bv):
    """Pure-JAX reference of the PyTorch forward pass, for sanity checking."""
    B, T, C = x.shape
    outs = []
    for h in range(wq.shape[0]):
        q = x @ wq[h] + bq[h]
        k = x @ wk[h] + bk[h]
        v = x @ wv[h] + bv[h]
        wei = (q @ jnp.swapaxes(k, -2, -1)) * head_size ** (-0.5)
        tril = jnp.tril(jnp.ones((T, T)))
        wei = jnp.where(tril == 0, -jnp.inf, wei)
        wei = jax.nn.softmax(wei, axis=-1)
        outs.append(wei @ v)
    return jnp.concatenate(outs, axis=-1)


if __name__ == "__main__":
    key = jax.random.PRNGKey(0)
    kx, kwq, kwk, kwv, kbq, kbk, kbv = jax.random.split(key, 7)

    B, T = 2, block_size  # (2, 8, 32) input

    # Deterministic parameter init (uniform, like nn.Linear's default range).
    bound = 1.0 / (n_embd ** 0.5)
    x = jax.random.normal(kx, (B, T, n_embd), dtype=jnp.float32)
    wq = jax.random.uniform(kwq, (num_heads, n_embd, head_size), jnp.float32, -bound, bound)
    wk = jax.random.uniform(kwk, (num_heads, n_embd, head_size), jnp.float32, -bound, bound)
    wv = jax.random.uniform(kwv, (num_heads, n_embd, head_size), jnp.float32, -bound, bound)
    bq = jax.random.uniform(kbq, (num_heads, head_size), jnp.float32, -bound, bound)
    bk = jax.random.uniform(kbk, (num_heads, head_size), jnp.float32, -bound, bound)
    bv = jax.random.uniform(kbv, (num_heads, head_size), jnp.float32, -bound, bound)

    w_fused, b_fused = pack_qkv_params(wq, wk, wv, bq, bk, bv)

    out = multi_head_attention(x, w_fused, b_fused)
    out = jax.block_until_ready(out)

    ref = _reference(x, wq, wk, wv, bq, bk, bv)
    assert out.shape == (B, T, num_heads * head_size), out.shape
    # Tolerance slightly relaxed vs 1e-5 because the softmax denominator uses the
    # hardware approximate reciprocal (EUP); error is well below this bound.
    assert jnp.allclose(out, ref, atol=2e-3, rtol=2e-3), "mismatch vs reference"

    print("KERNEL_OK")
</pallas_src>

<mosaic_0001>
module attributes {stable_mosaic.version = 11 : i64} {
  func.func @_mha_fused_kernel(%arg0: memref<2x8x32xf32, #tpu.memory_space<vmem>>, %arg1: memref<32x128xf32, #tpu.memory_space<vmem>>, %arg2: memref<1x128xf32, #tpu.memory_space<vmem>>, %arg3: memref<2x8x32xf32, #tpu.memory_space<vmem>>) attributes {dimension_semantics = [], scalar_prefetch = 0 : i64, scratch_operands = 0 : i64, tpu.core_type = #tpu.core_type<tc>} {
    %c0 = arith.constant 0 : index
    %c0_0 = arith.constant 0 : index
    %c0_1 = arith.constant 0 : index
    %0 = vector.load %arg0[%c0, %c0_0, %c0_1] : memref<2x8x32xf32, #tpu.memory_space<vmem>>, vector<2x8x32xf32>
    %c0_2 = arith.constant 0 : index
    %c0_3 = arith.constant 0 : index
    %1 = vector.load %arg1[%c0_2, %c0_3] : memref<32x128xf32, #tpu.memory_space<vmem>>, vector<32x128xf32>
    %c0_4 = arith.constant 0 : index
    %c0_5 = arith.constant 0 : index
    %2 = vector.load %arg2[%c0_4, %c0_5] : memref<1x128xf32, #tpu.memory_space<vmem>>, vector<1x128xf32>
    %3 = vector.shape_cast %0 : vector<2x8x32xf32> to vector<16x32xf32>
    %cst = arith.constant dense<0.000000e+00> : vector<16x128xf32>
    %4 = tpu.matmul %3, %1, %cst {dimension_numbers = #tpu.dot_dimension_numbers<[1], [0], [0], [1], [0, 0, 1, 1], [], []>} : vector<16x32xf32>, vector<32x128xf32>, vector<16x128xf32> -> vector<16x128xf32>
    %5 = vector.broadcast %2 : vector<1x128xf32> to vector<16x128xf32>
    %6 = arith.addf %4, %5 : vector<16x128xf32>
    %7 = vector.extract_strided_slice %6 {offsets = [0, 0], sizes = [16, 32], strides = [1, 1]} : vector<16x128xf32> to vector<16x32xf32>
    %8 = vector.extract_strided_slice %6 {offsets = [0, 32], sizes = [16, 32], strides = [1, 1]} : vector<16x128xf32> to vector<16x32xf32>
    %9 = vector.extract_strided_slice %6 {offsets = [0, 64], sizes = [16, 32], strides = [1, 1]} : vector<16x128xf32> to vector<16x32xf32>
    %10 = tpu.iota {dimensions = array<i32: 0>} : vector<8x8xi32>
    %11 = tpu.iota {dimensions = array<i32: 1>} : vector<8x8xi32>
    %12 = arith.cmpi sle, %11, %10 : vector<8x8xi32>
    %cst_6 = arith.constant 0.000000e+00 : f32
    %cst_7 = arith.constant 0xFF800000 : f32
    %13 = vector.broadcast %cst_6 : f32 to vector<8x8xf32>
    %14 = vector.broadcast %cst_7 : f32 to vector<8x8xf32>
    %15 = arith.select %12, %13, %14 : vector<8x8xi1>, vector<8x8xf32>
    %16 = vector.shape_cast %15 : vector<8x8xf32> to vector<1x8x8xf32>
    %17 = vector.extract_strided_slice %7 {offsets = [0, 0], sizes = [16, 16], strides = [1, 1]} : vector<16x32xf32> to vector<16x16xf32>
    %18 = vector.shape_cast %17 : vector<16x16xf32> to vector<2x8x16xf32>
    %19 = vector.extract_strided_slice %8 {offsets = [0, 0], sizes = [16, 16], strides = [1, 1]} : vector<16x32xf32> to vector<16x16xf32>
    %20 = vector.shape_cast %19 : vector<16x16xf32> to vector<2x8x16xf32>
    %21 = vector.extract_strided_slice %9 {offsets = [0, 0], sizes = [16, 16], strides = [1, 1]} : vector<16x32xf32> to vector<16x16xf32>
    %22 = vector.shape_cast %21 : vector<16x16xf32> to vector<2x8x16xf32>
    "tpu.trace_start"() <{level = 10 : i32, message = "btd,bsd->bts"}> : () -> ()
    %cst_8 = arith.constant dense<0.000000e+00> : vector<2x8x8xf32>
    %23 = tpu.matmul %18, %20, %cst_8 {dimension_numbers = #tpu.dot_dimension_numbers<[2], [2], [1], [1], [0, 0, 0, 1, 1, 1], [0], [0]>} : vector<2x8x16xf32>, vector<2x8x16xf32>, vector<2x8x8xf32> -> vector<2x8x8xf32>
    "tpu.trace_stop"() : () -> ()
    %cst_9 = arith.constant 2.500000e-01 : f32
    %24 = vector.broadcast %cst_9 : f32 to vector<2x8x8xf32>
    %25 = arith.mulf %23, %24 : vector<2x8x8xf32>
    %26 = vector.broadcast %16 : vector<1x8x8xf32> to vector<2x8x8xf32>
    %27 = arith.addf %25, %26 : vector<2x8x8xf32>
    %cst_10 = arith.constant dense<0xFF800000> : vector<2x8xf32>
    %28 = vector.multi_reduction <maximumf>, %27, %cst_10 [2] : vector<2x8x8xf32> to vector<2x8xf32>
    %29 = vector.shape_cast %28 : vector<2x8xf32> to vector<2x8x1xf32>
    %30 = vector.broadcast %29 : vector<2x8x1xf32> to vector<2x8x8xf32>
    %31 = arith.subf %27, %30 : vector<2x8x8xf32>
    %32 = math.exp %31 : vector<2x8x8xf32>
    %cst_11 = arith.constant dense<0.000000e+00> : vector<2x8xf32>
    %33 = vector.multi_reduction <add>, %32, %cst_11 [2] : vector<2x8x8xf32> to vector<2x8xf32>
    %34 = vector.shape_cast %33 : vector<2x8xf32> to vector<2x8x1xf32>
    %35 = tpu.reciprocal %34 {approx = true} : vector<2x8x1xf32> -> vector<2x8x1xf32>
    %36 = vector.broadcast %35 : vector<2x8x1xf32> to vector<2x8x8xf32>
    %37 = arith.mulf %32, %36 : vector<2x8x8xf32>
    "tpu.trace_start"() <{level = 10 : i32, message = "bts,bsd->btd"}> : () -> ()
    %cst_12 = arith.constant dense<0.000000e+00> : vector<2x8x16xf32>
    %38 = tpu.matmul %37, %22, %cst_12 {dimension_numbers = #tpu.dot_dimension_numbers<[2], [1], [1], [2], [0, 0, 0, 1, 1, 2], [0], [0]>} : vector<2x8x8xf32>, vector<2x8x16xf32>, vector<2x8x16xf32> -> vector<2x8x16xf32>
    "tpu.trace_stop"() : () -> ()
    %39 = vector.extract_strided_slice %7 {offsets = [0, 16], sizes = [16, 16], strides = [1, 1]} : vector<16x32xf32> to vector<16x16xf32>
    %40 = vector.shape_cast %39 : vector<16x16xf32> to vector<2x8x16xf32>
    %41 = vector.extract_strided_slice %8 {offsets = [0, 16], sizes = [16, 16], strides = [1, 1]} : vector<16x32xf32> to vector<16x16xf32>
    %42 = vector.shape_cast %41 : vector<16x16xf32> to vector<2x8x16xf32>
    %43 = vector.extract_strided_slice %9 {offsets = [0, 16], sizes = [16, 16], strides = [1, 1]} : vector<16x32xf32> to vector<16x16xf32>
    %44 = vector.shape_cast %43 : vector<16x16xf32> to vector<2x8x16xf32>
    "tpu.trace_start"() <{level = 10 : i32, message = "btd,bsd->bts"}> : () -> ()
    %cst_13 = arith.constant dense<0.000000e+00> : vector<2x8x8xf32>
    %45 = tpu.matmul %40, %42, %cst_13 {dimension_numbers = #tpu.dot_dimension_numbers<[2], [2], [1], [1], [0, 0, 0, 1, 1, 1], [0], [0]>} : vector<2x8x16xf32>, vector<2x8x16xf32>, vector<2x8x8xf32> -> vector<2x8x8xf32>
    "tpu.trace_stop"() : () -> ()
    %cst_14 = arith.constant 2.500000e-01 : f32
    %46 = vector.broadcast %cst_14 : f32 to vector<2x8x8xf32>
    %47 = arith.mulf %45, %46 : vector<2x8x8xf32>
    %48 = vector.broadcast %16 : vector<1x8x8xf32> to vector<2x8x8xf32>
    %49 = arith.addf %47, %48 : vector<2x8x8xf32>
    %cst_15 = arith.constant dense<0xFF800000> : vector<2x8xf32>
    %50 = vector.multi_reduction <maximumf>, %49, %cst_15 [2] : vector<2x8x8xf32> to vector<2x8xf32>
    %51 = vector.shape_cast %50 : vector<2x8xf32> to vector<2x8x1xf32>
    %52 = vector.broadcast %51 : vector<2x8x1xf32> to vector<2x8x8xf32>
    %53 = arith.subf %49, %52 : vector<2x8x8xf32>
    %54 = math.exp %53 : vector<2x8x8xf32>
    %cst_16 = arith.constant dense<0.000000e+00> : vector<2x8xf32>
    %55 = vector.multi_reduction <add>, %54, %cst_16 [2] : vector<2x8x8xf32> to vector<2x8xf32>
    %56 = vector.shape_cast %55 : vector<2x8xf32> to vector<2x8x1xf32>
    %57 = tpu.reciprocal %56 {approx = true} : vector<2x8x1xf32> -> vector<2x8x1xf32>
    %58 = vector.broadcast %57 : vector<2x8x1xf32> to vector<2x8x8xf32>
    %59 = arith.mulf %54, %58 : vector<2x8x8xf32>
    "tpu.trace_start"() <{level = 10 : i32, message = "bts,bsd->btd"}> : () -> ()
    %cst_17 = arith.constant dense<0.000000e+00> : vector<2x8x16xf32>
    %60 = tpu.matmul %59, %44, %cst_17 {dimension_numbers = #tpu.dot_dimension_numbers<[2], [1], [1], [2], [0, 0, 0, 1, 1, 2], [0], [0]>} : vector<2x8x8xf32>, vector<2x8x16xf32>, vector<2x8x16xf32> -> vector<2x8x16xf32>
    "tpu.trace_stop"() : () -> ()
    %61 = tpu.concatenate %38, %60 in 2 : vector<2x8x16xf32>, vector<2x8x16xf32> -> vector<2x8x32xf32>
    %c0_18 = arith.constant 0 : index
    %c0_19 = arith.constant 0 : index
    %c0_20 = arith.constant 0 : index
    %62 = vector.load %arg3[%c0_18, %c0_19, %c0_20] : memref<2x8x32xf32, #tpu.memory_space<vmem>>, vector<2x8x32xf32>
    tpu.vector_store %arg3[%c0_18, %c0_19, %c0_20], %61 {strides = array<i32>} : memref<2x8x32xf32, #tpu.memory_space<vmem>>, vector<2x8x32xf32>,
    return
  }
}

</mosaic_0001>

<bundles_post_ra>
// kernel: multi_head_attention.1
= control target key start
LH: loop header
LB: loop body
LE: loop exit
PB: predicated region body
PF: predicated region fallthrough
CT: control target
= control target key end

     0   :  { %8 = vsyncpa [#allocation3], 0  ;;  %s1153_s0 = inlined_call_operand.hbm [shape: f32[2,8,32], index: 0, kind: input, shape index: {}]   ;;  %s1154_s1 = inlined_call_operand.hbm [shape: f32[32,128], index: 1, kind: input, shape index: {}]   ;;  %s1155_s2 = inlined_call_operand.vmem [shape: f32[1,128], index: 2, kind: input, shape index: {}]   ;;  %s1156_s3 = inlined_call_operand.hbm [shape: f32[2,8,32], index: 3, kind: output, shape index: {}]  }
   0x1   :  { %9 = vsyncpa [#allocation6], 0 }
   0x2   :  { %10 = vsyncpa [#allocation4], 0  ;;  %s1026_s12 = smov [#allocation2]  }
   0x3   :  { %s16_s13 = sshll.u32 %s1026_s12, 4  ;;  %s17_s13 = int_to_ptr.vmem [resolvable:$true] %s16_s13 }
   0x4   :  { %s968_s14 = scalar_lea.vmem %s17_s13, 256  ;;  %p973_p1 = scmp.lt.s32.totalorder %s17_s13, %s17_s13 }
   0x5   :  { %p969_p0 = scmp.ne.s32.totalorder %s17_s13, %s968_s14  ;;  %p974_p2 = scmp.lt.s32.totalorder %s968_s14, %s968_s14 }
   0x7   :  { %p975_p3 = por %p974_p2, %p973_p1 }
   0x9   :  { %p976_p4 = pnand %p975_p3, %p969_p0 }
   0xb   :  { %979 = shalt.err (!%p976_p4)
}
   0xc   :  { %s1027_s15 = smov 128   ;;  %s1028_s16 = smov 8  }
   0xd   :  { %22 = dma.hbm_to_vmem [thread:$0]  %s1153_s0, 256, %s17_s13, [#allocation3], %s1027_s15, %s1027_s15, %s1028_s16  }
   0xe   :  { %s1029_s19 = smov [#allocation5]  }
   0xf   :  { %s28_s20 = sshll.u32 %s1029_s19, 4  ;;  %s29_s20 = int_to_ptr.vmem [resolvable:$true] %s28_s20 }
  0x10   :  { %s988_s21 = scalar_lea.vmem %s29_s20, 512  ;;  %p993_p6 = scmp.lt.s32.totalorder %s29_s20, %s29_s20 }
  0x11   :  { %p989_p5 = scmp.ne.s32.totalorder %s29_s20, %s988_s21  ;;  %p994_p7 = scmp.lt.s32.totalorder %s988_s21, %s988_s21 }
  0x13   :  { %p995_p8 = por %p994_p7, %p993_p6 }
  0x15   :  { %p996_p9 = pnand %p995_p8, %p989_p5 }
  0x17   :  { %999 = shalt.err (!%p996_p9)
}
  0x18   :  { %34 = dma.hbm_to_vmem [thread:$0]  %s1154_s1, 512, %s29_s20, [#allocation6], %s1027_s15, %s1027_s15, %s1028_s16  }
  0x19   :  { %1020 = dma.done.wait [#allocation3], 256  }
  0x1a   :  { %1021 = vsyncadd [#allocation3], 4294967040 }
  0x1b   :  { %1022 = dma.done.wait [#allocation6], 512  }
  0x1c   :  { %1023 = vsyncadd [#allocation6], 4294966784  ;;  %vm56_vm0 = vcmask 261120   ;;  %v48_v0 = vld [vmem:[#allocation5 + $0x18] sm:$0xff]  ;;  %v47_v1 = vld [vmem:[#allocation5 + $0x10] sm:$0xff]  ;;  %v1030_v6 = vmov 0.0   ;;  %v138_v14 = vlaneseq }
  0x1d   :  { %879 = vmatprep.subr.mxu0 %v48_v0  ;;  %v43_v2 = vld [vmem:[#allocation2] sm:$0xff]  ;;  %v46_v3 = vld [vmem:[#allocation5 + $0x8] sm:$0xff]  ;;  %v45_v4 = vld [vmem:[#allocation5] sm:$0xff]  ;;  %890 = vmatprep.subr.mxu1 %v1030_v6  ;;  %vm1031_vm1 = vmmov 0   ;;  %s1032_s24 = smov 96   ;;  %vm147_vm2 = vcmask 130048  }
  0x1e   :  { %880 = vmatpush3.msra.mxu0 %v48_v0  ;;  %887 = vmatprep.mubr.msk.f32.mxu0 %vm56_vm0, %v43_v2  ;;  %v44_v5 = vld [vmem:[#allocation2 + $0x8] sm:$0xff]  ;;  %v842_v8 = vld [vmem:[%s1155_s2] ss:$0 sm:$0xff]  ;;  %v139_v15 = vshrl.u32 %v138_v14, 7  ;;  %v141_v16 = vand.u32 127, %v138_v14  ;;  %v1033_v18 = vmov -inf  }
  0x1f   :  { %881 = vmatprep.subr.mxu0 %v47_v1  ;;  %892 = vmatprep.mubr.msk.f32.mxu1 %vm1031_vm1, %v1030_v6  ;;  %vm303_vm4 = vcmask 64512   ;;  %s1034_s2 = smov 64   ;;  %s1035_s25 = smov 80  }
  0x20   :  { %882 = vmatpush3.msra.mxu0 %v47_v1  ;;  %vm142_vm3 = vcmp.le.s32.totalorder %v141_v16, %v139_v15  ;;  %s1036_s26 = smov 112   ;;  %s1037_s27 = smov 48  }
  0x21   :  { %883 = vmatprep.subr.mxu0 %v46_v3  ;;  %v1101_v19 = vsel %vm142_vm3, 0.0, %v1033_v18  ;;  %s1038_s28 = smov 16   ;;  %s1039_s29 = smov [#allocation7]  }
  0x22   :  { %884 = vmatpush3.msra.mxu0 %v46_v3  ;;  %s829_s30 = sshll.u32 %s1039_s29, 4  ;;  %s830_s30 = int_to_ptr.vmem [resolvable:$true] %s829_s30 }
  0x23   :  { %885 = vmatprep.subr.mxu0 %v45_v4  ;;  %s1000_s4 = scalar_lea.vmem %s830_s30, 256  ;;  %p1005_p11 = scmp.lt.s32.totalorder %s830_s30, %s830_s30 }
  0x24   :  { %886 = vmatpush3.msra.mxu0 %v45_v4  ;;  %p1001_p10 = scmp.ne.s32.totalorder %s830_s30, %s1000_s4  ;;  %p1006_p12 = scmp.lt.s32.totalorder %s1000_s4, %s1000_s4 }
  0x25   :  { %888 = vmatmul.mubr.msk.f32.vlgmr.msra.gmra.mxu0 %vm56_vm0, %v44_v5  ;;  %900 = vmatprep.subr.mxu0 %v1030_v6 }
  0x26   :  { %902 = vmatprep.mubr.msk.f32.mxu0 %vm1031_vm1, %v1030_v6  ;;  %p1007_p13 = por %p1006_p12, %p1005_p11 }
  0x28   :  { %p1008_p0 = pnand %p1007_p13, %p1001_p10 }
  0xe5   :  { %v889_v7 = vpop.f32.mrf.mxu0 }
  0xe6   :  { %v1086_v11 = vadd.f32 %v889_v7, %v842_v8 }
  0xe7   :  { %v129_v9 = vpop.f32.mrf.mxu0 }
  0xe8   :  { %v1083_v10 = vadd.f32 %v842_v8, %v129_v9 }
  0xea   :  { %145 = vrot.lane.b32.xlu0 %v1083_v10, %s1032_s24 }
  0xee   :  { %223 = vrot.lane.b32.xlu0 %v1086_v11, %s1032_s24 }
 0x15c   :  { %v146_v12 = vpop.permute.xlu0 %145 }
 0x15d   :  { %891 = vmatpush3.xpose.msk.msra.mxu1 %vm147_vm2, %v146_v12 }
 0x15e   :  { %895 = vmatprep.subr.mxu1 %v1030_v6 }
 0x160   :  { %893 = vmatmul.mubr.msk.f32.vlgmr.msra.gmra.mxu1 %vm147_vm2, %v1083_v10  ;;  %v224_v13 = vpop.permute.xlu0 %223 }
 0x161   :  { %896 = vmatpush3.xpose.msk.msra.mxu1 %vm147_vm2, %v224_v13  ;;  %897 = vmatprep.mubr.msk.f32.mxu1 %vm1031_vm1, %v1030_v6 }
 0x162   :  { %905 = vmatprep.subr.mxu1 %v1030_v6 }
 0x164   :  { %898 = vmatmul.mubr.msk.f32.vlgmr.msra.gmra.mxu1 %vm147_vm2, %v1086_v11 }
 0x165   :  { %907 = vmatprep.mubr.msk.f32.mxu1 %vm1031_vm1, %v1030_v6 }
 0x220   :  { %v218_v17 = vpop.f32.mrf.mxu1 }
 0x221   :  { %v299_v20 = vmul.f32 0.25, %v218_v17 }
 0x222   :  { %v894_v21 = vpop.f32.mrf.mxu1 }
 0x223   :  { %v301_v22 = vadd.f32 %v299_v20, %v1101_v19 }
 0x224   :  { %v295_v23 = vpop.f32.mrf.mxu1 }
 0x225   :  { %v300_v24 = vmul.f32 0.25, %v295_v23  ;;  %v304_v25 = vsel %vm303_vm4, %v301_v22, -inf }
 0x226   :  { %305 = vmax.xlane.f32.xlu1 %v304_v25  ;;  %v899_v26 = vpop.f32.mrf.mxu1 }
 0x227   :  { %v302_v27 = vadd.f32 %v300_v24, %v1101_v19 }
 0x229   :  { %v307_v28 = vsel %vm303_vm4, %v302_v27, -inf }
 0x22a   :  { %308 = vmax.xlane.f32.xlu1 %v307_v28 }
 0x23b   :  { %326 = vrot.lane.b32.xlu1 %v1083_v10, %s1034_s2 }
 0x23f   :  { %402 = vrot.lane.b32.xlu1 %v1086_v11, %s1034_s2 }
 0x243   :  { %480 = vrot.lane.b32.xlu1 %v1083_v10, %s1035_s25 }
 0x247   :  { %558 = vrot.lane.b32.xlu1 %v1086_v11, %s1035_s25 }
 0x2af   :  { %v306_v29 = vpop.xlane.xlu1 %305 }
 0x2b0   :  { %v310_v30 = vsub.f32 %v301_v22, %v306_v29 }
 0x2b2   :  { %v312_v31 = vmul.f32 1.442695, %v310_v30 }
 0x2b3   :  { %v309_v32 = vpop.xlane.xlu1 %308 }
 0x2b4   :  { %944 = vpow2.f32 %v312_v31  ;;  %v311_v33 = vsub.f32 %v302_v27, %v309_v32 }
 0x2b6   :  { %v314_v34 = vmul.f32 1.442695, %v311_v33 }
 0x2b7   :  { %v327_v35 = vpop.permute.xlu1 %326 }
 0x2b8   :  { %946 = vpow2.f32 %v314_v34  ;;  %901 = vmatpush3.msra.mxu0 %v327_v35 }
 0x2b9   :  { %910 = vmatprep.subr.mxu0 %v1030_v6 }
 0x2bb   :  { %v403_v36 = vpop.permute.xlu1 %402 }
 0x2bc   :  { %906 = vmatpush3.msra.mxu1 %v403_v36 }
 0x2bd   :  { %915 = vmatprep.subr.mxu1 %v1030_v6 }
 0x2bf   :  { %v481_v41 = vpop.permute.xlu1 %480 }
 0x2c1   :  { %v945_v37 = vpop.eup %944 }
 0x2c2   :  { %v316_v38 = vsel %vm303_vm4, %v945_v37, 0.0 }
 0x2c3   :  { %317 = vadd.xlane.f32.xlu0 %v316_v38  ;;  %v559_v42 = vpop.permute.xlu1 %558 }
 0x2c5   :  { %v947_v39 = vpop.eup %946 }
 0x2c6   :  { %v319_v40 = vsel %vm303_vm4, %v947_v39, 0.0 }
 0x2c7   :  { %320 = vadd.xlane.f32.xlu1 %v319_v40 }
 0x2d8   :  { %556 = vrot.lane.b32.xlu1 %v1086_v11, %s1036_s26 }
 0x2d9   :  { %478 = vrot.lane.b32.xlu0 %v1083_v10, %s1036_s26 }
 0x34c   :  { %v318_v43 = vpop.xlane.xlu0 %317 }
 0x34d   :  { %948 = vrcp.f32 %v318_v43 }
 0x350   :  { %v321_v44 = vpop.xlane.xlu1 %320  ;;  %v479_v49 = vpop.permute.xlu0 %478 }
 0x351   :  { %950 = vrcp.f32 %v321_v44 }
 0x354   :  { %v557_v50 = vpop.permute.xlu1 %556 }
 0x35a   :  { %v949_v45 = vpop.eup %948 }
 0x35b   :  { %v324_v46 = vmul.f32 %v949_v45, %v945_v37 }
 0x35d   :  { %903 = vmatmul.mubr.msk.f32.vlgmr.msra.gmra.mxu0 %vm303_vm4, %v324_v46 }
 0x35e   :  { %v951_v47 = vpop.eup %950  ;;  %911 = vmatpush3.xpose.msk.msra.mxu0 %vm147_vm2, %v481_v41  ;;  %912 = vmatprep.mubr.msk.f32.mxu0 %vm1031_vm1, %v1030_v6 }
 0x35f   :  { %v325_v48 = vmul.f32 %v951_v47, %v947_v39  ;;  %920 = vmatprep.subr.mxu0 %v1030_v6 }
 0x361   :  { %908 = vmatmul.mubr.msk.f32.vlgmr.msra.gmra.mxu1 %vm303_vm4, %v325_v48  ;;  %913 = vmatmul.mubr.msk.f32.vlgmr.msra.gmra.mxu0 %vm147_vm2, %v479_v49 }
 0x362   :  { %916 = vmatpush3.xpose.msk.msra.mxu1 %vm147_vm2, %v559_v42  ;;  %917 = vmatprep.mubr.msk.f32.mxu1 %vm1031_vm1, %v1030_v6 }
 0x363   :  { %925 = vmatprep.subr.mxu1 %v1030_v6  ;;  %922 = vmatprep.mubr.msk.f32.mxu0 %vm1031_vm1, %v1030_v6 }
 0x365   :  { %918 = vmatmul.mubr.msk.f32.vlgmr.msra.gmra.mxu1 %vm147_vm2, %v557_v50 }
 0x366   :  { %927 = vmatprep.mubr.msk.f32.mxu1 %vm1031_vm1, %v1030_v6 }
 0x41d   :  { %v398_v51 = vpop.f32.mrf.mxu0 }
 0x41f   :  { %v904_v52 = vpop.f32.mrf.mxu0 }
 0x421   :  { %v474_v53 = vpop.f32.mrf.mxu1  ;;  %v552_v54 = vpop.f32.mrf.mxu0 }
 0x422   :  { %v634_v55 = vmul.f32 0.25, %v552_v54 }
 0x423   :  { %v909_v56 = vpop.f32.mrf.mxu1  ;;  %v914_v57 = vpop.f32.mrf.mxu0 }
 0x424   :  { %v636_v58 = vadd.f32 %v634_v55, %v1101_v19 }
 0x425   :  { %v630_v59 = vpop.f32.mrf.mxu1 }
 0x426   :  { %v635_v60 = vmul.f32 0.25, %v630_v59  ;;  %v638_v61 = vsel %vm303_vm4, %v636_v58, -inf }
 0x427   :  { %v919_v62 = vpop.f32.mrf.mxu1  ;;  %639 = vmax.xlane.f32.xlu1 %v638_v61 }
 0x428   :  { %v637_v63 = vadd.f32 %v635_v60, %v1101_v19 }
 0x42a   :  { %v641_v0 = vsel %vm303_vm4, %v637_v63, -inf }
 0x42b   :  { %642 = vmax.xlane.f32.xlu0 %v641_v0 }
 0x441   :  { %736 = vrot.lane.b32.xlu0 %v1086_v11, %s1037_s27 }
 0x4b0   :  { %v640_v1 = vpop.xlane.xlu1 %639 }
 0x4b1   :  { %v644_v2 = vsub.f32 %v636_v58, %v640_v1 }
 0x4b3   :  { %v646_v3 = vmul.f32 1.442695, %v644_v2 }
 0x4b4   :  { %v643_v4 = vpop.xlane.xlu0 %642 }
 0x4b5   :  { %952 = vpow2.f32 %v646_v3  ;;  %v645_v5 = vsub.f32 %v637_v63, %v643_v4 }
 0x4b7   :  { %v648_v6 = vmul.f32 1.442695, %v645_v5 }
 0x4b8   :  { %v737_v7 = vpop.permute.xlu0 %736 }
 0x4b9   :  { %954 = vpow2.f32 %v648_v6  ;;  %926 = vmatpush3.msra.mxu1 %v737_v7 }
 0x4c2   :  { %v953_v8 = vpop.eup %952 }
 0x4c3   :  { %v650_v9 = vsel %vm303_vm4, %v953_v8, 0.0 }
 0x4c4   :  { %651 = vadd.xlane.f32.xlu1 %v650_v9 }
 0x4c6   :  { %v955_v12 = vpop.eup %954 }
 0x4c7   :  { %v653_v13 = vsel %vm303_vm4, %v955_v12, 0.0 }
 0x4c8   :  { %654 = vadd.xlane.f32.xlu1 %v653_v13 }
 0x4d9   :  { %660 = vrot.lane.b32.xlu1 %v1083_v10, %s1037_s27 }
 0x54d   :  { %v652_v11 = vpop.xlane.xlu1 %651 }
 0x54e   :  { %956 = vrcp.f32 %v652_v11 }
 0x551   :  { %v655_v14 = vpop.xlane.xlu1 %654 }
 0x552   :  { %958 = vrcp.f32 %v655_v14 }
 0x555   :  { %v661_v15 = vpop.permute.xlu1 %660 }
 0x556   :  { %921 = vmatpush3.msra.mxu0 %v661_v15 }
 0x55b   :  { %v957_v16 = vpop.eup %956 }
 0x55c   :  { %v658_v17 = vmul.f32 %v957_v16, %v953_v8 }
 0x55e   :  { %923 = vmatmul.mubr.msk.f32.vlgmr.msra.gmra.mxu0 %vm303_vm4, %v658_v17 }
 0x55f   :  { %v959_v18 = vpop.eup %958 }
 0x560   :  { %v659_v19 = vmul.f32 %v959_v18, %v955_v12 }
 0x562   :  { %928 = vmatmul.mubr.msk.f32.vlgmr.msra.gmra.mxu1 %vm303_vm4, %v659_v19 }
 0x61e   :  { %v732_v20 = vpop.f32.mrf.mxu0 }
 0x61f   :  { %814 = vrot.lane.b32.xlu1 %v732_v20, %s1038_s28 }
 0x620   :  { %v924_v21 = vpop.f32.mrf.mxu0 }
 0x622   :  { %v808_v22 = vpop.f32.mrf.mxu1 }
 0x623   :  { %816 = vrot.lane.b32.xlu1 %v808_v22, %s1038_s28 }
 0x624   :  { %v929_v10 = vpop.f32.mrf.mxu1 }
 0x691   :  { %v815_v23 = vpop.permute.xlu1 %814 }
 0x692   :  { %v820_v24 = vsel %vm147_vm2, %v398_v51, %v815_v23 }
 0x693   :  { %822 = vst.msk [vmem:[#allocation7] sm:$0xff] %vm56_vm0, %v820_v24 }
 0x695   :  { %v817_v25 = vpop.permute.xlu1 %816 }
 0x696   :  { %v821_v26 = vsel %vm147_vm2, %v474_v53, %v817_v25 }
 0x697   :  { %823 = vst.msk [vmem:[#allocation7 + $0x8] sm:$0xff] %vm56_vm0, %v821_v26 }
 0x698   :  { %1011 = shalt.err (!%p1008_p0)
}
 0x699   :  { %835 = dma.vmem_to_hbm [thread:$0]  %s830_s30, 256, %s1156_s3, [#allocation4], %s1027_s15, %s1027_s15, %s1028_s16  }
 0x69a   :  { %1024 = dma.done.wait [#allocation4], 256  }
 0x69b   :  { %1025 = vsyncadd [#allocation4], 4294967040 }
 0x69c   :  { %839 = vsyncpa [#allocation3], 1 }
 0x69d   :  { %840 = vsyncpa [#allocation6], 1 }
 0x69e   :  { %841 = vsyncpa [#allocation4], 1 }

</bundles_post_ra>
